<compile_context>
chip_gen: v7x
topology: tpu7x:2x2x1
jax: 0.10.0
libtpu: 0.0.40
codegen_flags: <defaults>
</compile_context>

<pallas_src>
import functools

import jax
import jax.numpy as jnp
import numpy as np
from jax import lax
from jax.experimental import pallas as pl
from jax.experimental.pallas import tpu as pltpu


def cqa_kernel(ctx_ref, qry_ref, cw_ref, qw_ref, dw_ref, out_ref, *,
               bb, feat_dim, query_side, mxu_dtype):
    D = feat_dim
    cw = cw_ref[...].astype(jnp.float32)      # (1, D)
    qw = qw_ref[...].astype(jnp.float32)      # (1, D)
    dw = dw_ref[...].astype(mxu_dtype)        # (D, D), hoisted across the Bb loop

    def body(b, carry):
        ctx = ctx_ref[b]                      # (Tc, D), input dtype
        qry = qry_ref[b]                      # (Tq, D)
        ctx_f = ctx.astype(jnp.float32)
        ctx_m = ctx.astype(mxu_dtype)
        qry_m = qry.astype(mxu_dtype)

        if query_side:
            # Tq < Tc:  qd = qry @ dw^T + cw  (folds the context bias);
            #           sim = ctx @ qd^T + (qry @ qw)^T.
            qd = lax.dot_general(qry_m, dw, (((1,), (1,)), ((), ())),
                                 preferred_element_type=jnp.float32)       # (Tq, D)
            qd = qd + cw
            sim = lax.dot_general(ctx_m, qd.astype(mxu_dtype),
                                  (((1,), (1,)), ((), ())),
                                  preferred_element_type=jnp.float32)      # (Tc, Tq)
            q_bias = lax.dot_general(qw.astype(mxu_dtype), qry_m,
                                     (((1,), (1,)), ((), ())),
                                     preferred_element_type=jnp.float32)   # (1, Tq)
            sim = sim + q_bias
        else:
            # Tc <= Tq: cd = ctx @ dw + qw  (folds the query bias);
            #           sim = cd @ qry^T + (ctx @ cw).
            cd = jnp.dot(ctx_m, dw, preferred_element_type=jnp.float32)    # (Tc, D)
            cd = cd + qw
            sim = lax.dot_general(cd.astype(mxu_dtype), qry_m,
                                  (((1,), (1,)), ((), ())),
                                  preferred_element_type=jnp.float32)      # (Tc, Tq)
            ctx_bias = jnp.sum(ctx_f * cw, axis=-1, keepdims=True)         # (Tc, 1)
            sim = sim + ctx_bias

        # Dual softmax, NaN-safe: per-row max for axis=-1, per-column max for
        # axis=-2 (two exps; EUP slot is separate so this is nearly free).
        row_max = jnp.max(sim, axis=-1, keepdims=True)                     # (Tc, 1)
        col_max = jnp.max(sim, axis=-2, keepdims=True)                     # (1, Tq)
        e_row = jnp.exp(sim - row_max)
        e_col = jnp.exp(sim - col_max)
        row_sum = jnp.sum(e_row, axis=-1, keepdims=True)                   # (Tc, 1)
        col_sum = jnp.sum(e_col, axis=-2, keepdims=True)                   # (1, Tq)
        c2q_sim = e_row * pl.reciprocal(row_sum, approx=True)              # softmax -1
        q2c_sim = e_col * pl.reciprocal(col_sum, approx=True)              # softmax -2

        c2q_p = c2q_sim.astype(mxu_dtype)
        # q2c = (c2q_sim @ q2c_sim^T) @ ctx  ==  c2q_sim @ (q2c_sim^T @ ctx)
        qtc = lax.dot_general(q2c_sim.astype(mxu_dtype), ctx_m,
                              (((0,), (0,)), ((), ())),
                              preferred_element_type=jnp.float32)          # (Tq, D)
        if D % 128 == 0:
            # Fuse the two second-stage matmuls: one (Tc,Tq)@(Tq,2D) dot with a
            # tile-aligned concat; doubles the MXU N dim and pushes the LHS
            # through the MXU only once.
            rhs = jnp.concatenate([qry_m, qtc.astype(mxu_dtype)], axis=-1)
            both = jnp.dot(c2q_p, rhs, preferred_element_type=jnp.float32)
            c2q, q2c = both[:, :D], both[:, D:]
        else:
            c2q = jnp.dot(c2q_p, qry_m, preferred_element_type=jnp.float32)
            q2c = jnp.dot(c2q_p, qtc.astype(mxu_dtype),
                          preferred_element_type=jnp.float32)

        # Assemble the (Tc, 4D) tile in registers and issue one lane-dense
        # store (four D-wide slice stores would be masked vst when D%128!=0).
        out_tile = jnp.concatenate(
            [ctx_f, c2q, ctx_f * c2q, ctx_f * q2c], axis=-1)
        out_ref[b] = out_tile.astype(out_ref.dtype)
        return carry

    lax.fori_loop(0, bb, body, None, unroll=True)


def _padded_bytes(rows, cols, itemsize):
    # VMEM tiles are padded to (8, 128) (f32-equivalent accounting).
    return (-(-rows // 8) * 8) * (-(-cols // 128) * 128) * itemsize


def context_query_attention(context, query, context_weights, query_weights,
                            dot_weights, *, mxu_dtype=jnp.float32,
                            target_grid_steps=8):
    B, Tc, Dc = context.shape
    Bq, Tq, Dq = query.shape
    assert B == Bq
    assert Dc == Dq, "context*c2q in the reference module requires equal dims"
    D = Dc
    out_dim = 4 * D
    out_dtype = context.dtype

    # Rank-1 bias weights as (1, D) rows (lane-major): no (D, 1) MXU matmuls.
    cw_row = context_weights.reshape(1, D).astype(jnp.float32)
    qw_row = query_weights.reshape(1, D).astype(jnp.float32)

    in_isz = jnp.dtype(context.dtype).itemsize
    out_isz = jnp.dtype(out_dtype).itemsize
    mxu_isz = jnp.dtype(mxu_dtype).itemsize

    # VMEM accounting per batch element: double-buffered pipeline blocks plus
    # resident f32 intermediates.
    per_batch_blocks = 2 * (_padded_bytes(Tc, D, in_isz)
                            + _padded_bytes(Tq, D, in_isz)
                            + _padded_bytes(Tc, out_dim, out_isz))
    per_batch_tmp = (6 * _padded_bytes(Tc, Tq, 4)
                     + 5 * _padded_bytes(Tc, D, 4)
                     + 3 * _padded_bytes(Tq, D, 4)
                     + _padded_bytes(Tc, out_dim, 4))
    weight_bytes = (_padded_bytes(D, D, 4) + _padded_bytes(D, D, mxu_isz)
                    + 2 * _padded_bytes(1, D, 4))

    # Derive the VMEM cap from hardware (v5e/v6e: 128 MiB, v7x: 64 MiB) with
    # ~25% headroom for Mosaic internal scratch / semaphores.
    try:
        vmem_cap = int(pltpu.get_tpu_info().vmem_capacity_bytes)
    except Exception:
        vmem_cap = 64 * 1024 * 1024      # conservative fallback (v7x size)
    vmem_budget = int(0.75 * vmem_cap)

    # Batch elements per grid step: amortize the ~0.35us/step overhead while
    # keeping >= target_grid_steps pipelined steps and fitting the VMEM budget.
    per_batch_total = per_batch_blocks + per_batch_tmp
    bb_cap = max(1, min(B // max(target_grid_steps, 1),
                        (vmem_budget // 2) // max(per_batch_total, 1)))
    bb = 1
    for cand in range(1, min(bb_cap, B) + 1):
        if B % cand == 0:
            bb = cand

    vmem_limit = int(min(max(2 * (bb * per_batch_total + weight_bytes),
                             8 * 1024 * 1024),
                         vmem_budget))

    tmin = min(Tc, Tq)
    flops = B * (2 * tmin * D * D + 8 * Tc * Tq * D + 6 * Tc * D + 2 * Tq * D)
    transcendentals = B * 2 * Tc * Tq
    bytes_accessed = (B * (Tc * D + Tq * D) * in_isz
                      + B * Tc * out_dim * out_isz
                      + (D * D + 2 * D) * 4)

    kernel = functools.partial(cqa_kernel, bb=bb, feat_dim=D,
                               query_side=(Tq < Tc), mxu_dtype=mxu_dtype)
    return pl.pallas_call(
        kernel,
        out_shape=jax.ShapeDtypeStruct((B, Tc, out_dim), out_dtype),
        grid=(B // bb,),
        in_specs=[
            pl.BlockSpec((bb, Tc, D), lambda i: (i, 0, 0)),   # context
            pl.BlockSpec((bb, Tq, D), lambda i: (i, 0, 0)),   # query
            pl.BlockSpec((1, D), lambda i: (0, 0)),           # context_weights row
            pl.BlockSpec((1, D), lambda i: (0, 0)),           # query_weights row
            pl.BlockSpec((D, D), lambda i: (0, 0)),           # dot_weights
        ],
        out_specs=pl.BlockSpec((bb, Tc, out_dim), lambda i: (i, 0, 0)),
        compiler_params=pltpu.CompilerParams(
            dimension_semantics=("parallel",),
            vmem_limit_bytes=vmem_limit),
        cost_estimate=pl.CostEstimate(flops=flops,
                                      transcendentals=transcendentals,
                                      bytes_accessed=bytes_accessed),
    )(context, query, cw_row, qw_row, dot_weights)


def reference(context, query, cw, qw, dw):
    sim = (jnp.einsum('bcd,de,bqe->bcq', context, dw, query)
           + jnp.swapaxes(query @ qw, -1, -2)
           + context @ cw)
    c2q_sim = jax.nn.softmax(sim, axis=-1)
    q2c_sim = jax.nn.softmax(sim, axis=-2)
    c2q = c2q_sim @ query
    q2c = (c2q_sim @ jnp.swapaxes(q2c_sim, -1, -2)) @ context
    return jnp.concatenate([context, c2q, context * c2q, context * q2c],
                           axis=-1)


if __name__ == "__main__":
    key = jax.random.PRNGKey(0)
    k1, k2, k3, k4, k5 = jax.random.split(key, 5)

    # Shapes consistent with the module: batch=2, Tc=16, Tq=8, hidden=32.
    B, Tc, Tq, D = 2, 16, 8, 32
    context = jax.random.normal(k1, (B, Tc, D), dtype=jnp.float32)
    query = jax.random.normal(k2, (B, Tq, D), dtype=jnp.float32)

    # Deterministic parameter init (shapes from TrilinearSimilarity.__init__).
    context_weights = 0.1 * jax.random.normal(k3, (D, 1), dtype=jnp.float32)
    query_weights = 0.1 * jax.random.normal(k4, (D, 1), dtype=jnp.float32)
    dot_weights = 0.1 * jax.random.normal(k5, (D, D), dtype=jnp.float32)

    ref = reference(context, query, context_weights, query_weights, dot_weights)

    # 1) f32 path, Tq < Tc: query-side reassociation of the trilinear term.
    out = context_query_attention(context, query, context_weights,
                                  query_weights, dot_weights,
                                  mxu_dtype=jnp.float32)
    out = jax.block_until_ready(out)
    assert out.shape == (B, Tc, 4 * D)
    np.testing.assert_allclose(np.asarray(out), np.asarray(ref),
                               rtol=5e-3, atol=5e-3)

    # 2) f32 path, Tc <= Tq: context-side reassociation.
    ctx2 = jax.random.normal(k1, (B, Tq, D), dtype=jnp.float32)   # Tc' = 8
    qry2 = jax.random.normal(k2, (B, Tc, D), dtype=jnp.float32)   # Tq' = 16
    ref2 = reference(ctx2, qry2, context_weights, query_weights, dot_weights)
    out2 = context_query_attention(ctx2, qry2, context_weights,
                                   query_weights, dot_weights,
                                   mxu_dtype=jnp.float32)
    out2 = jax.block_until_ready(out2)
    np.testing.assert_allclose(np.asarray(out2), np.asarray(ref2),
                               rtol=5e-3, atol=5e-3)

    # 3) bf16 activations + bf16 MXU operands (f32 accumulation, f32 softmax):
    #    halves input DMA and the dominant output write stream.
    ctx_bf = context.astype(jnp.bfloat16)
    qry_bf = query.astype(jnp.bfloat16)
    ref_bf = reference(ctx_bf.astype(jnp.float32), qry_bf.astype(jnp.float32),
                       context_weights, query_weights, dot_weights)
    out_bf = context_query_attention(ctx_bf, qry_bf, context_weights,
                                     query_weights, dot_weights,
                                     mxu_dtype=jnp.bfloat16)
    out_bf = jax.block_until_ready(out_bf)
    assert out_bf.dtype == jnp.bfloat16
    np.testing.assert_allclose(np.asarray(out_bf, dtype=np.float32),
                               np.asarray(ref_bf),
                               rtol=1e-1, atol=2e-1)

    print("KERNEL_OK")
</pallas_src>

<mosaic_0001>
module attributes {stable_mosaic.version = 11 : i64} {
  func.func @cqa_kernel(%arg0: i32, %arg1: memref<1x16x32xf32, #tpu.memory_space<vmem>>, %arg2: memref<1x8x32xf32, #tpu.memory_space<vmem>>, %arg3: memref<1x32xf32, #tpu.memory_space<vmem>>, %arg4: memref<1x32xf32, #tpu.memory_space<vmem>>, %arg5: memref<32x32xf32, #tpu.memory_space<vmem>>, %arg6: memref<1x16x128xf32, #tpu.memory_space<vmem>>) attributes {dimension_semantics = [#tpu.dimension_semantics<parallel>], iteration_bounds = array<i64: 2>, scalar_prefetch = 0 : i64, scratch_operands = 0 : i64, tpu.core_type = #tpu.core_type<tc>, window_params = [{transform_indices = @transform_0, window_bounds = array<i64: 1, 16, 32>}, {transform_indices = @transform_1, window_bounds = array<i64: 1, 8, 32>}, {pipeline_mode = #tpu.pipeline_mode<synchronous>, transform_indices = @transform_2, window_bounds = array<i64: 1, 32>}, {pipeline_mode = #tpu.pipeline_mode<synchronous>, transform_indices = @transform_3, window_bounds = array<i64: 1, 32>}, {pipeline_mode = #tpu.pipeline_mode<synchronous>, transform_indices = @transform_4, window_bounds = array<i64: 32, 32>}, {transform_indices = @transform_5, window_bounds = array<i64: 1, 16, 128>}]} {
    %c0 = arith.constant 0 : index
    %c0_0 = arith.constant 0 : index
    %0 = vector.load %arg3[%c0, %c0_0] : memref<1x32xf32, #tpu.memory_space<vmem>>, vector<1x32xf32>
    %c0_1 = arith.constant 0 : index
    %c0_2 = arith.constant 0 : index
    %1 = vector.load %arg4[%c0_1, %c0_2] : memref<1x32xf32, #tpu.memory_space<vmem>>, vector<1x32xf32>
    %c0_3 = arith.constant 0 : index
    %c0_4 = arith.constant 0 : index
    %2 = vector.load %arg5[%c0_3, %c0_4] : memref<32x32xf32, #tpu.memory_space<vmem>>, vector<32x32xf32>
    %c0_i32 = arith.constant 0 : i32
    %3 = arith.index_cast %c0_i32 : i32 to index
    %c0_5 = arith.constant 0 : index
    %c0_6 = arith.constant 0 : index
    %4 = vector.load %arg1[%3, %c0_5, %c0_6] : memref<1x16x32xf32, #tpu.memory_space<vmem>>, vector<1x16x32xf32>
    %5 = vector.shape_cast %4 : vector<1x16x32xf32> to vector<16x32xf32>
    %6 = arith.index_cast %c0_i32 : i32 to index
    %c0_7 = arith.constant 0 : index
    %c0_8 = arith.constant 0 : index
    %7 = vector.load %arg2[%6, %c0_7, %c0_8] : memref<1x8x32xf32, #tpu.memory_space<vmem>>, vector<1x8x32xf32>
    %8 = vector.shape_cast %7 : vector<1x8x32xf32> to vector<8x32xf32>
    %cst = arith.constant dense<0.000000e+00> : vector<8x32xf32>
    %9 = tpu.matmul %8, %2, %cst {dimension_numbers = #tpu.dot_dimension_numbers<[1], [1], [0], [0], [0, 0, 1, 0], [], []>} : vector<8x32xf32>, vector<32x32xf32>, vector<8x32xf32> -> vector<8x32xf32>
    %10 = vector.broadcast %0 : vector<1x32xf32> to vector<8x32xf32>
    %11 = arith.addf %9, %10 : vector<8x32xf32>
    %cst_9 = arith.constant dense<0.000000e+00> : vector<16x8xf32>
    %12 = tpu.matmul %5, %11, %cst_9 {dimension_numbers = #tpu.dot_dimension_numbers<[1], [1], [0], [0], [0, 0, 1, 0], [], []>} : vector<16x32xf32>, vector<8x32xf32>, vector<16x8xf32> -> vector<16x8xf32>
    %cst_10 = arith.constant dense<0.000000e+00> : vector<1x8xf32>
    %13 = tpu.matmul %1, %8, %cst_10 {dimension_numbers = #tpu.dot_dimension_numbers<[1], [1], [0], [0], [0, 0, 1, 0], [], []>} : vector<1x32xf32>, vector<8x32xf32>, vector<1x8xf32> -> vector<1x8xf32>
    %14 = vector.broadcast %13 : vector<1x8xf32> to vector<16x8xf32>
    %15 = arith.addf %12, %14 : vector<16x8xf32>
    %cst_11 = arith.constant dense<0xFF800000> : vector<16xf32>
    %16 = vector.multi_reduction <maximumf>, %15, %cst_11 [1] : vector<16x8xf32> to vector<16xf32>
    %17 = vector.shape_cast %16 : vector<16xf32> to vector<16x1xf32>
    %cst_12 = arith.constant dense<0xFF800000> : vector<8xf32>
    %18 = vector.multi_reduction <maximumf>, %15, %cst_12 [0] : vector<16x8xf32> to vector<8xf32>
    %19 = vector.shape_cast %18 : vector<8xf32> to vector<1x8xf32>
    %20 = vector.broadcast %17 : vector<16x1xf32> to vector<16x8xf32>
    %21 = arith.subf %15, %20 : vector<16x8xf32>
    %22 = math.exp %21 : vector<16x8xf32>
    %23 = vector.broadcast %19 : vector<1x8xf32> to vector<16x8xf32>
    %24 = arith.subf %15, %23 : vector<16x8xf32>
    %25 = math.exp %24 : vector<16x8xf32>
    %cst_13 = arith.constant dense<0.000000e+00> : vector<16xf32>
    %26 = vector.multi_reduction <add>, %22, %cst_13 [1] : vector<16x8xf32> to vector<16xf32>
    %27 = vector.shape_cast %26 : vector<16xf32> to vector<16x1xf32>
    %cst_14 = arith.constant dense<0.000000e+00> : vector<8xf32>
    %28 = vector.multi_reduction <add>, %25, %cst_14 [0] : vector<16x8xf32> to vector<8xf32>
    %29 = vector.shape_cast %28 : vector<8xf32> to vector<1x8xf32>
    %30 = tpu.reciprocal %27 {approx = true} : vector<16x1xf32> -> vector<16x1xf32>
    %31 = vector.broadcast %30 : vector<16x1xf32> to vector<16x8xf32>
    %32 = arith.mulf %22, %31 : vector<16x8xf32>
    %33 = tpu.reciprocal %29 {approx = true} : vector<1x8xf32> -> vector<1x8xf32>
    %34 = vector.broadcast %33 : vector<1x8xf32> to vector<16x8xf32>
    %35 = arith.mulf %25, %34 : vector<16x8xf32>
    %cst_15 = arith.constant dense<0.000000e+00> : vector<8x32xf32>
    %36 = tpu.matmul %35, %5, %cst_15 {dimension_numbers = #tpu.dot_dimension_numbers<[0], [0], [1], [1], [0, 1, 1, 1], [], []>} : vector<16x8xf32>, vector<16x32xf32>, vector<8x32xf32> -> vector<8x32xf32>
    %cst_16 = arith.constant dense<0.000000e+00> : vector<16x32xf32>
    %37 = tpu.matmul %32, %8, %cst_16 {dimension_numbers = #tpu.dot_dimension_numbers<[1], [0], [0], [1], [0, 0, 1, 1], [], []>} : vector<16x8xf32>, vector<8x32xf32>, vector<16x32xf32> -> vector<16x32xf32>
    %cst_17 = arith.constant dense<0.000000e+00> : vector<16x32xf32>
    %38 = tpu.matmul %32, %36, %cst_17 {dimension_numbers = #tpu.dot_dimension_numbers<[1], [0], [0], [1], [0, 0, 1, 1], [], []>} : vector<16x8xf32>, vector<8x32xf32>, vector<16x32xf32> -> vector<16x32xf32>
    %39 = arith.mulf %5, %37 : vector<16x32xf32>
    %40 = arith.mulf %5, %38 : vector<16x32xf32>
    %41 = tpu.concatenate %5, %37, %39, %40 in 1 : vector<16x32xf32>, vector<16x32xf32>, vector<16x32xf32>, vector<16x32xf32> -> vector<16x128xf32>
    %42 = arith.index_cast %c0_i32 : i32 to index
    %c0_18 = arith.constant 0 : index
    %c0_19 = arith.constant 0 : index
    %43 = vector.load %arg6[%42, %c0_18, %c0_19] : memref<1x16x128xf32, #tpu.memory_space<vmem>>, vector<1x16x128xf32>
    %44 = vector.shape_cast %43 : vector<1x16x128xf32> to vector<16x128xf32>
    %45 = vector.shape_cast %41 : vector<16x128xf32> to vector<1x16x128xf32>
    tpu.vector_store %arg6[%42, %c0_18, %c0_19], %45 {strides = array<i32>} : memref<1x16x128xf32, #tpu.memory_space<vmem>>, vector<1x16x128xf32>,
    %c1_i32 = arith.constant 1 : i32
    return
  }
  func.func @transform_0(%arg0: i32) -> (i32, i32, i32) {
    %c0_i32 = arith.constant 0 : i32
    %c0_i32_0 = arith.constant 0 : i32
    %c0_i32_1 = arith.constant 0 : i32
    return %arg0, %c0_i32, %c0_i32_0 : i32, i32, i32
  }
  func.func @transform_1(%arg0: i32) -> (i32, i32, i32) {
    %c0_i32 = arith.constant 0 : i32
    %c0_i32_0 = arith.constant 0 : i32
    %c0_i32_1 = arith.constant 0 : i32
    return %arg0, %c0_i32, %c0_i32_0 : i32, i32, i32
  }
  func.func @transform_2(%arg0: i32) -> (i32, i32) {
    %c0_i32 = arith.constant 0 : i32
    %c0_i32_0 = arith.constant 0 : i32
    %c0_i32_1 = arith.constant 0 : i32
    return %c0_i32, %c0_i32_0 : i32, i32
  }
  func.func @transform_3(%arg0: i32) -> (i32, i32) {
    %c0_i32 = arith.constant 0 : i32
    %c0_i32_0 = arith.constant 0 : i32
    %c0_i32_1 = arith.constant 0 : i32
    return %c0_i32, %c0_i32_0 : i32, i32
  }
  func.func @transform_4(%arg0: i32) -> (i32, i32) {
    %c0_i32 = arith.constant 0 : i32
    %c0_i32_0 = arith.constant 0 : i32
    %c0_i32_1 = arith.constant 0 : i32
    return %c0_i32, %c0_i32_0 : i32, i32
  }
  func.func @transform_5(%arg0: i32) -> (i32, i32, i32) {
    %c0_i32 = arith.constant 0 : i32
    %c0_i32_0 = arith.constant 0 : i32
    %c0_i32_1 = arith.constant 0 : i32
    return %arg0, %c0_i32, %c0_i32_0 : i32, i32, i32
  }
}

</mosaic_0001>

<bundles_post_ra>
// kernel: tpu_custom_call.1
= control target key start
LH: loop header
LB: loop body
LE: loop exit
PB: predicated region body
PF: predicated region fallthrough
CT: control target
= control target key end

     0   :  { %s1725_s0 = inlined_call_operand.hbm [shape: f32[2,16,32], index: 0, kind: input, shape index: {}]   ;;  %s1726_s1 = inlined_call_operand.hbm [shape: f32[2,8,32], index: 1, kind: input, shape index: {}]   ;;  %s1727_s2 = inlined_call_operand.vmem [shape: f32[1,32], index: 2, kind: input, shape index: {}]   ;;  %s1728_s3 = inlined_call_operand.vmem [shape: f32[1,32], index: 3, kind: input, shape index: {}]   ;;  %s1729_s4 = inlined_call_operand.hbm [shape: f32[32,32], index: 4, kind: input, shape index: {}]   ;;  %s1730_s5 = inlined_call_operand.hbm [shape: f32[2,16,128], index: 5, kind: output, shape index: {}]  }
   0x1   :  { %1735 = sst [smem:[#allocation14_spill]] %s1725_s0 }
   0x2   :  { %1736 = sst [smem:[#allocation15_spill]] %s1729_s4 }
   0x3   :  { %10 = vsyncpa [#allocation3], 0 }
   0x4   :  { %12 = vsyncpa [#allocation3 + $0x1], 0 }
   0x5   :  { %13 = vsyncpa [#allocation6], 0 }
   0x6   :  { %15 = vsyncpa [#allocation6 + $0x1], 0 }
   0x7   :  { %16 = vsyncpa [#allocation4], 0 }
   0x8   :  { %18 = vsyncpa [#allocation4 + $0x1], 0  ;;  %s1422_s18 = smov 0   ;;  %s1424_s19 = smov 0  }
   0x9   :  { %s1426_s20 = smov 0   ;;  %s1428_s21 = smov 0  }
   0xa LB: > { %s1443_s22 = sadd.s32 4294967295, %s1376_s21   ;;  %s1023_s23 = sadd.s32 4294967294, %s1376_s21   ;;  %s1376_s21 = sphi %s1428_s21, %s1759_s21   ;;  %s1372_s20 = sphi %s1426_s20, %s1758_s20   ;;  %s1368_s19 = sphi %s1424_s19, %s1757_s19   ;;  %s1364_s18 = sphi %s1422_s18, %s1756_s18  }
   0xb   : > { %p44_p0 = scmp.ne.s32.totalorder %s1368_s19, %s1364_s18  ;;  %p1731_p1 = scmp.eq.s32.totalorder %s1443_s22, 0 }
   0xc   : > { %p163_p3 = scmp.eq.s32.totalorder %s1023_s23, 1  ;;  %p1024_p5 = scmp.ge.s32.totalorder %s1376_s21, 1 }
   0xd   : > { %p1452_p4 = por %p1731_p1, %p44_p0  ;;  %p170_p7 = scmp.lt.s32.totalorder %s1376_s21, 3 }
   0xe   : > { %p1457_p6 = por %p163_p3, %p44_p0  ;;  %s1378_s27 = smov [#allocation7]  }
   0xf   : > { %s1737_s24 = scalar_select %p1452_p4, 1, 0 }
  0x10   : > { %s1738_s25 = scalar_select %p1457_p6, 1, 0 }
  0x11   : > { %p1462_p8 = pnand %p1024_p5, %p170_p7  ;;  %s188_s28 = sshll.u32 %s1378_s27, 4  ;;  %s1466_s28 = int_to_ptr.vmem [resolvable:$true] %s188_s28 }
  0x12   : > { %s1478_s30 = sadd.s32 1, %s1376_s21   ;;  %s31_s6 = sadd.s32 1, %s1372_s20 }
  0x13   : > { %s1739_s26 = scalar_select %p1462_p8, 1, 0 }
  0x14   : > { %p1138_p9 = pneg %p1462_p8  ;;  %s28_s7 = ssub.s32 %s1376_s21, %s1478_s30 }
  0x15   : > { %s1741_s4 = sld [smem:[#allocation15_spill]] }
  0x16   : > { %p1473_p11 = pnand %p1138_p9, %p1731_p1 }
  0x18   : > { %p1216_p13 = pneg %p1473_p11 }
  0x1b   : > { %s1214_s10 = scalar_lea.hbm %s1741_s4, 512 }
  0x1c   : > { %p1215_p12 = scmp.ne.s32.totalorder %s1741_s4, %s1214_s10  ;;  %p1221_p5 = scmp.lt.u32.totalorder %s1214_s10, %s1741_s4 }
  0x1e   : > { %p1217_p0 = pnand %p1216_p13, %p1215_p12 }
  0x20   : > { %p1218_p3 = pneg %p1217_p0 }
  0x22   : > { %p1223_p7 = pnand %p1221_p5, %p1218_p3 }
  0x24   : > { %1226 = shalt.err (!%p1223_p7)
}
  0x25   : > { %s1227_s15 = scalar_lea.vmem %s1466_s28, 512  ;;  %p1235_p2 = scmp.lt.s32.totalorder %s1466_s28, %s1466_s28 }
  0x26   : > { %p1228_p9 = scmp.ne.s32.totalorder %s1466_s28, %s1227_s15  ;;  %p1236_p6 = scmp.lt.s32.totalorder %s1227_s15, %s1227_s15 }
  0x28   : > { %p1230_p10 = pnand %p1228_p9, %p1216_p13  ;;  %p1237_p4 = por %p1236_p6, %p1235_p2 }
  0x2a   : > { %p1231_p1 = pneg %p1230_p10 }
  0x2c   : > { %p1238_p8 = pnand %p1237_p4, %p1231_p1 }
  0x2e   : > { %1241 = shalt.err (!%p1238_p8)
}
  0x2f   : > { %s1379_s16 = smov 128   ;;  %s1380_s17 = smov 8  }
  0x30   : > { %1141 = dma.hbm_to_vmem [thread:$0]  (!%p1473_p11), %s1741_s4, 512, %s1466_s28, [#allocation6], %s1379_s16, %s1379_s16, %s1380_s17  }
  0x31   : > { %p29_p1 = scmp.eq.s32.totalorder %s28_s7, 0  ;;  %p38_p2 = scmp.ne.s32.totalorder %s1372_s20, %s1368_s19 }
  0x32   : > { %p39_p4 = scmp.eq.s32.totalorder %s1376_s21, 0  ;;  %p1154_p6 = scmp.lt.s32.totalorder %s1376_s21, 2 }
  0x33   : > { %s1512_s8 = scalar_select %p29_p1, %s1372_s20, %s31_s6  }
  0x34   : > { %p40_p8 = por %p39_p4, %p38_p2  ;;  %p1743_p10 = scmp.eq.s32.totalorder %s1443_s22, 1 }
  0x35   : > { %1742 = sst [smem:[#allocation13_spill]] %s1512_s8  ;;  %s1521_s29 = sand.u32 1, %s1372_s20  }
  0x36   : > { %p1516_p12 = por %p1743_p10, %p38_p2  ;;  %s1058_s10 = sshll.u32 %s1376_s21, 8 }
  0x37   : > { %s1027_s11 = sshll.u32 %s1521_s29, 4  ;;  %s1745_s0 = sld [smem:[#allocation14_spill]] }
  0x38   : > { %s1744_s9 = scalar_select %p1516_p12, 1, 0 }
  0x39   : > { %s206_s6 = scalar_lea.vmem [#allocation2], %s1027_s11  ;;  %p1530_p11 = pnand %p1154_p6, %p40_p8 }
  0x3a   : > { %s213_s13 = sshll.u32 %s206_s6, 4  ;;  %s203_s23 = scalar_lea.sflag [#allocation3], %s1521_s29  ;;  %s1534_s13 = int_to_ptr.vmem [resolvable:$true] %s213_s13 }
  0x3b   : > { %p1244_p0 = pneg %p1530_p11 }
  0x3d   : > { %s1528_s7 = scalar_lea.hbm %s1745_s0, %s1058_s10  ;;  %s1247_s28 = scalar_lea.hbm %s1745_s0, 512 }
  0x3e   : > { %s1242_s27 = scalar_lea.hbm %s1528_s7, 256  ;;  %p1248_p7 = scmp.lt.u32.totalorder %s1528_s7, %s1745_s0 }
  0x3f   : > { %p1243_p13 = scmp.ne.s32.totalorder %s1528_s7, %s1242_s27  ;;  %p1249_p9 = scmp.lt.u32.totalorder %s1247_s28, %s1242_s27 }
  0x40   : > { %p1251_p2 = scmp.lt.u32.totalorder %s1242_s27, %s1528_s7 }
  0x41   : > { %p1245_p3 = pnand %p1244_p0, %p1243_p13  ;;  %p1250_p1 = por %p1249_p9, %p1248_p7 }
  0x43   : > { %p1246_p5 = pneg %p1245_p3  ;;  %p1252_p4 = por %p1251_p2, %p1250_p1 }
  0x45   : > { %p1253_p6 = pnand %p1252_p4, %p1246_p5 }
  0x47   : > { %1256 = shalt.err (!%p1253_p6)
}
  0x48   : > { %s1257_s15 = scalar_lea.vmem %s1534_s13, 256  ;;  %s1381_s10 = smov [#allocation2]  }
  0x49   : > { %p1258_p8 = scmp.ne.s32.totalorder %s1534_s13, %s1257_s15  ;;  %s1262_s11 = sshll.u32 %s1381_s10, 4  ;;  %s1263_s11 = int_to_ptr.vmem [resolvable:$false] %s1262_s11 }
  0x4a   : > { %s1264_s12 = scalar_lea.vmem %s1263_s11, 512  ;;  %p1265_p3 = scmp.lt.s32.totalorder %s1534_s13, %s1263_s11 }
  0x4b   : > { %p1260_p10 = pnand %p1258_p8, %p1244_p0  ;;  %p1266_p7 = scmp.lt.s32.totalorder %s1264_s12, %s1257_s15 }
  0x4d   : > { %p1261_p13 = pneg %p1260_p10  ;;  %p1267_p9 = por %p1266_p7, %p1265_p3 }
  0x4f   : > { %p1268_p1 = pnand %p1267_p9, %p1261_p13 }
  0x51   : > { %1271 = shalt.err (!%p1268_p1)
}
  0x52   : > { %1145 = dma.hbm_to_vmem [thread:$0]  (!%p1530_p11), %s1528_s7, 256, %s1534_s13, %s203_s23, %s1379_s16, %s1379_s16, %s1380_s17  }
  0x53   : > { %s1030_s27 = sshll.u32 %s1521_s29, 3  ;;  %s1031_s28 = sshll.u32 %s1376_s21, 7 }
  0x54   : > { %s1573_s10 = scalar_lea.hbm %s1726_s1, %s1031_s28  ;;  %s227_s11 = scalar_lea.vmem [#allocation5], %s1030_s27 }
  0x55   : > { %s234_s12 = sshll.u32 %s227_s11, 4  ;;  %s1747_s0 = sand.u32 1, %s1376_s21   ;;  %s235_s12 = int_to_ptr.vmem [resolvable:$true] %s234_s12 }
  0x56   : > { %s224_s4 = scalar_lea.sflag [#allocation6], %s1747_s0  ;;  %s1272_s8 = scalar_lea.hbm %s1573_s10, 128 }
  0x57   : > { %p1273_p5 = scmp.ne.s32.totalorder %s1573_s10, %s1272_s8  ;;  %s1277_s29 = scalar_lea.hbm %s1726_s1, 256 }
  0x58   : > { %p1278_p6 = scmp.lt.u32.totalorder %s1573_s10, %s1726_s1  ;;  %p1279_p8 = scmp.lt.u32.totalorder %s1277_s29, %s1272_s8 }
  0x59   : > { %p1275_p2 = pnand %p1273_p5, %p1244_p0  ;;  %p1281_p13 = scmp.lt.u32.totalorder %s1272_s8, %s1573_s10 }
  0x5a   : > { %p1280_p10 = por %p1279_p8, %p1278_p6 }
  0x5b   : > { %p1276_p4 = pneg %p1275_p2 }
  0x5c   : > { %p1282_p3 = por %p1281_p13, %p1280_p10 }
  0x5e   : > { %p1283_p7 = pnand %p1282_p3, %p1276_p4 }
  0x60   : > { %1286 = shalt.err (!%p1283_p7)
}
  0x61   : > { %s1287_s0 = scalar_lea.vmem %s235_s12, 128  ;;  %s1382_s23 = smov [#allocation5]  }
  0x62   : > { %p1288_p9 = scmp.ne.s32.totalorder %s235_s12, %s1287_s0  ;;  %s1292_s27 = sshll.u32 %s1382_s23, 4  ;;  %s1293_s27 = int_to_ptr.vmem [resolvable:$false] %s1292_s27 }
  0x63   : > { %s1294_s28 = scalar_lea.vmem %s1293_s27, 256  ;;  %p1295_p2 = scmp.lt.s32.totalorder %s235_s12, %s1293_s27 }
  0x64   : > { %p1290_p1 = pnand %p1288_p9, %p1244_p0  ;;  %p1296_p12 = scmp.lt.s32.totalorder %s1294_s28, %s1287_s0 }
  0x66   : > { %p1291_p5 = pneg %p1290_p1  ;;  %p1297_p6 = por %p1296_p12, %p1295_p2 }
  0x68   : > { %p1298_p8 = pnand %p1297_p6, %p1291_p5 }
  0x6a   : > { %1301 = shalt.err (!%p1298_p8)
}
  0x6b   : > { %1148 = dma.hbm_to_vmem [thread:$0]  (!%p1530_p11), %s1573_s10, 128, %s235_s12, %s224_s4  }
  0x6c   : > { %p1748_p4 = scmp.ne.s32.totalorder %s1739_s26, 0 }
  0x6d   : > { %s1599_s8 = sand.u32 (!%p1748_p4), 1, %s1368_s19   ;;  %p1749_p12 = scmp.ne.s32.totalorder (!%p1748_p4), %s1737_s24, 0 }
  0x6e   : > { %243 = sbr.rel (%p1748_p4) target bundleno = 1327 (0x52f), region = 40  ;;  %s1033_s15 = sshll.u32 (!%p1748_p4), %s1599_s8, 4 }
  0x6f   : > { %s246_s6 = scalar_lea.sflag (!%p1748_p4), [#allocation3], %s1599_s8  ;;  %s1605_s11 = scalar_lea.vmem (!%p1748_p4), [#allocation2], %s1033_s15 }
  0x75   : > { %1347 = dma.done.wait (%p1749_p12), %s246_s6, 256  }
  0x76   : > { %1349 = vsyncadd (%p1749_p12), %s246_s6, 4294967040  ;;  %s254_s4 = sand.u32 1, %s1443_s22   ;;  %s1034_s26 = sshll.u32 %s1599_s8, 3 }
  0x77   : > { %s255_s14 = scalar_lea.sflag [#allocation6], %s254_s4  ;;  %s258_s10 = scalar_lea.vmem [#allocation5], %s1034_s26 }
  0x78   : > { %1351 = dma.done.wait (%p1749_p12), %s255_s14, 128  }
  0x79   : > { %1353 = vsyncadd (%p1749_p12), %s255_s14, 4294967168  ;;  %p1750_p11 = scmp.eq.s32.totalorder %s1443_s22, 0 }
  0x7b   : > { %1355 = dma.done.wait (%p1750_p11), [#allocation6], 512   ;;  %p1751_p0 = pmov %p1750_p11 }
  0x7c   : > { %v1383_v0 = vmov 0.0|0.0   ;;  %vm1384_vm0 = vmmov 0   ;;  %v1385_v1 = vmov 0.0   ;;  %vm309_vm1 = vcmask 261120   ;;  %v296_v2 = vld [vmem:[#allocation7] sm:$0xff]  ;;  %v297_v3 = vld [vmem:[#allocation7 + $0x8] sm:$0xff] }
  0x7d   : > { %1357 = vsyncadd (%p1751_p0), [#allocation6], 4294966784  ;;  %1117 = vmatprep.subr.bf16.mxu0 %v1383_v0  ;;  %1087 = vmatprep.mubr.msk.f32.mxu0 %vm1384_vm0, %v1385_v1  ;;  %v1118_v4 = vpack.c.bf16 %v297_v3, %v296_v2  ;;  %v1625_v5 = vld [vmem:[%s258_s10] sm:$0xff]  ;;  %v1646_v15 = vld [vmem:[%s1605_s11 + $0x8] sm:$0xff]  ;;  %v468_v18 = vlaneseq  ;;  %vm556_vm3 = vcmask 64512   ;;  %vm636_vm4 = vcmask 130048  }
  0x7e   : > { %1090 = vmatprep.subr.mxu1 %v1385_v1  ;;  %1092 = vmatprep.mubr.msk.f32.mxu1 %vm1384_vm0, %v1385_v1  ;;  %vm1119_vm2 = vmpackc.low %vm309_vm1, %vm309_vm1  ;;  %v298_v6 = vld [vmem:[#allocation7 + $0x10] sm:$0xff]  ;;  %v299_v7 = vld [vmem:[#allocation7 + $0x18] sm:$0xff]  ;;  %s1386_s29 = smov 32   ;;  %s1387_s7 = smov 64   ;;  %vm899_vm5 = vcmask 785408   ;;  %vm896_vm6 = vcmask 523264  }
  0x7f   : > { %1091 = vmatpush3.xpose.msk.msra.mxu1 %vm309_vm1, %v1625_v5  ;;  %1120 = vmatpush3.bf16.xpose.msk.msra.mxu0 %vm1119_vm2, %v1118_v4  ;;  %v1122_v8 = vpack.c.bf16 %v299_v7, %v298_v6  ;;  %v295_v9 = vld [vmem:[%s1728_s3] sm:$0x1]  ;;  %v469_v19 = vshrl.u32 %v468_v18, 7  ;;  %s1388_s13 = smov 96   ;;  %s293_s0 = scalar_lea.vmem [#allocation8], %s1033_s15 }
  0x80   : > { %1121 = vmatprep.subr.bf16.mxu0 %v1383_v0  ;;  %v1636_v10 = vld [vmem:[%s1605_s11] sm:$0xff]  ;;  %s918_s23 = sshll.u32 %s293_s0, 4  ;;  %s1059_s27 = sshll.u32 %s1443_s22, 8  ;;  %s1674_s23 = int_to_ptr.vmem [resolvable:$true] %s918_s23 }
  0x81   : > { %v1037_v11 = vld [vmem:[%s1727_s2] ss:$0 sm:$0xff]  ;;  %v470_v20 = vsub.s32 0, %v469_v19  ;;  %v1126_v45 = vpack.c.bf16 %v1646_v15, %v1636_v10  ;;  %s1681_s11 = scalar_lea.hbm %s1730_s5, %s1059_s27  ;;  %s905_s22 = scalar_lea.sflag [#allocation4], %s1599_s8 }
  0x82   : > { %1093 = vmatmul.mubr.msk.f32.vlgmr.msra.gmra.mrb[0].mxu1 %vm309_vm1, %v295_v9  ;;  %s1302_s15 = scalar_lea.vmem %s1674_s23, 256  ;;  %p1752_p13 = scmp.ne.s32.totalorder %s1744_s9, 0 }
  0x83   : > { %1097 = vmatprep.mubr.msk.f32.mxu1 %vm309_vm1, %v1636_v10  ;;  %p1303_p10 = scmp.ne.s32.totalorder %s1674_s23, %s1302_s15  ;;  %s1389_s4 = smov [#allocation8]  }
  0x84   : > { %s1306_s26 = sshll.u32 %s1389_s4, 4  ;;  %s1307_s26 = int_to_ptr.vmem [resolvable:$false] %s1306_s26 }
  0x85   : > { %p1304_p3 = pnand %p1303_p10, %p1752_p13  ;;  %s1308_s14 = scalar_lea.vmem %s1307_s26, 512 }
  0x86   : > { %p1309_p9 = scmp.lt.s32.totalorder %s1674_s23, %s1307_s26  ;;  %p1310_p1 = scmp.lt.s32.totalorder %s1308_s14, %s1302_s15 }
  0x87   : > { %1124 = vmatpush3.bf16.xpose.msk.msra.mxu0 %vm1119_vm2, %v1122_v8  ;;  %p1305_p7 = pneg %p1304_p3 }
  0x88   : > { %p1311_p5 = por %p1310_p1, %p1309_p9 }
  0x8a   : > { %p1312_p2 = pnand %p1311_p5, %p1305_p7 }
  0x8e   : > { %1088 = vmatmul.mubr.msk.f32.vlgmr.msra.gmra.mrb[0].mxu0 %vm309_vm1, %v1625_v5 }
 0x155   : > { %v464_v16 = vpop.f32.mrb[0].mxu1 }
 0x156   : > { %v1094_v17 = vpop.f32.mrb[1].mxu1  ;;  %v471_v21 = vrot.slane %v464_v16, %v470_v20 }
 0x161   : > { %v391_v12 = vpop.f32.mrb[0].mxu0 }
 0x162   : > { %v392_v13 = vadd.f32 %v1037_v11, %v391_v12  ;;  %v1089_v14 = vpop.f32.mrb[1].mxu0 }
 0x164   : > { %1095 = vmatprep.subr.msk.mxu1 %vm309_vm1, %v392_v13 }
 0x165   : > { %1096 = vmatpush3.xpose.msk.msra.mxu1 %vm309_vm1, %v392_v13 }
 0x166   : > { %1125 = vmatprep.subr.bf16.mxu1 %v1383_v0 }
 0x168   : > { %1098 = vmatmul.mubr.msk.f32.vlgmr.msra.gmra.mrb[2].mxu1 %vm309_vm1, %v1646_v15 }
 0x169   : > { %1104 = vmatprep.mubr.msk.f32.mxu1 %vm1384_vm0, %v1385_v1  ;;  %1127 = vmatpush3.bf16.msra.mxu1 %v1126_v45 }
 0x16a   : > { %1107 = vmatprep.subr.mxu1 %v1625_v5 }
 0x23b   : > { %v1099_v22 = vpop.f32.mrb[2].mxu1 }
 0x23c   : > { %v553_v23 = vadd.f32 %v1099_v22, %v471_v21  ;;  %v547_v24 = vpop.f32.mrb[3].mxu1 }
 0x23d   : > { %v548_v25 = vadd.f32 %v547_v24, %v471_v21 }
 0x23e   : > { %v560_v26 = vsel %vm556_vm3, %v553_v23, -inf }
 0x23f   : > { %v557_v27 = vsel %vm556_vm3, %v548_v25, -inf }
 0x240   : > { %558 = vmax.xlane.f32.xlu1 %v557_v27  ;;  %v563_v28 = vmax.f32 %v557_v27, %v560_v26 }
 0x242   : > { %v564_v29 = vrot.slane %v563_v28, 4 }
 0x244   : > { %561 = vmax.xlane.f32.xlu1 %v560_v26  ;;  %v565_v30 = vmax.f32 %v563_v28, %v564_v29 }
 0x246   : > { %v566_v31 = vrot.slane %v565_v30, 2 }
 0x248   : > { %v567_v32 = vmax.f32 %v565_v30, %v566_v31 }
 0x24a   : > { %v568_v33 = vrot.slane %v567_v32, 1 }
 0x24c   : > { %v569_v34 = vmax.f32 %v567_v32, %v568_v33 }
 0x24e   : > { %v576_v35 = vsub.f32 %v548_v25, %v569_v34  ;;  %v577_v36 = vsub.f32 %v553_v23, %v569_v34 }
 0x250   : > { %v578_v37 = vmul.f32 1.442695, %v576_v35  ;;  %v580_v38 = vmul.f32 1.442695, %v577_v36 }
 0x252   : > { %1200 = vpow2.f32 %v578_v37 }
 0x253   : > { %1202 = vpow2.f32 %v580_v38 }
 0x25c   : > { %v1201_v39 = vpop.eup %1200 }
 0x25d   : > { %v1203_v40 = vpop.eup %1202  ;;  %v588_v41 = vsel %vm556_vm3, %v1201_v39, 0.0 }
 0x25e   : > { %v589_v42 = vsel %vm556_vm3, %v1203_v40, 0.0 }
 0x25f   : > { %v590_v43 = vadd.f32 %v589_v42, %v588_v41 }
 0x261   : > { %v591_v44 = vrot.slane %v590_v43, 4 }
 0x263   : > { %v592_v46 = vadd.f32 %v591_v44, %v590_v43 }
 0x265   : > { %v593_v47 = vrot.slane %v592_v46, 2 }
 0x267   : > { %v594_v48 = vadd.f32 %v593_v47, %v592_v46 }
 0x269   : > { %v595_v49 = vrot.slane %v594_v48, 1 }
 0x26b   : > { %v596_v50 = vadd.f32 %v595_v49, %v594_v48 }
 0x26d   : > { %1204 = vrcp.f32 %v596_v50 }
 0x277   : > { %v1205_v51 = vpop.eup %1204 }
 0x278   : > { %v602_v52 = vmul.f32 %v1205_v51, %v1201_v39  ;;  %v603_v53 = vmul.f32 %v1205_v51, %v1203_v40 }
 0x27a   : > { %604 = vxpose.xlu0.b32.start [1/2] (short) (narrow) %v602_v52, 8 }
 0x27e   : > { %605 = vxpose.xlu0.b32.end [2/2] (short) (narrow) %v603_v53, 8 }
 0x2cd   : > { %v559_v54 = vpop.xlane.xlu1 %558 }
 0x2ce   : > { %v570_v55 = vsub.f32 %v548_v25, %v559_v54 }
 0x2d0   : > { %v572_v56 = vmul.f32 1.442695, %v570_v55 }
 0x2d1   : > { %v562_v57 = vpop.xlane.xlu1 %561 }
 0x2d2   : > { %1206 = vpow2.f32 %v572_v56  ;;  %v571_v58 = vsub.f32 %v553_v23, %v562_v57 }
 0x2d4   : > { %v574_v59 = vmul.f32 1.442695, %v571_v58 }
 0x2d6   : > { %1208 = vpow2.f32 %v574_v59 }
 0x2dc   : > { %v1207_v60 = vpop.eup %1206 }
 0x2dd   : > { %v582_v61 = vsel %vm556_vm3, %v1207_v60, 0.0 }
 0x2de   : > { %583 = vadd.xlane.f32.xlu0 %v582_v61 }
 0x2e0   : > { %v1209_v62 = vpop.eup %1208 }
 0x2e1   : > { %v585_v63 = vsel %vm556_vm3, %v1209_v62, 0.0 }
 0x2e2   : > { %586 = vadd.xlane.f32.xlu1 %v585_v63 }
 0x2fa   : > { %v620_v0 = vpop.trf.xlu0 }
 0x2fb   : > { %1105 = vmatmul.mubr.msk.f32.vlgmr.msra.gmra.mrb[4].mxu1 %vm636_vm4, %v620_v0 }
 0x2fc   : > { %1108 = vmatpush3.msra.mxu1 %v1625_v5 }
 0x36b   : > { %v584_v1 = vpop.xlane.xlu0 %583 }
 0x36c   : > { %1210 = vrcp.f32 %v584_v1 }
 0x36f   : > { %v587_v2 = vpop.xlane.xlu1 %586 }
 0x370   : > { %1212 = vrcp.f32 %v587_v2 }
 0x376   : > { %v1211_v3 = vpop.eup %1210 }
 0x377   : > { %v599_v4 = vmul.f32 %v1211_v3, %v1207_v60 }
 0x379   : > { %1109 = vmatprep.mubr.msk.f32.mxu1 %vm556_vm3, %v599_v4  ;;  %1114 = vmatprep.mubr.msk.f32.mxu0 %vm556_vm3, %v599_v4 }
 0x37a   : > { %v1213_v6 = vpop.eup %1212 }
 0x37b   : > { %v600_v7 = vmul.f32 %v1213_v6, %v1209_v62 }
 0x37d   : > { %1110 = vmatmul.mubr.msk.f32.vlgmr.msra.gmra.mrb[6].mxu1 %vm556_vm3, %v600_v7 }
 0x3ce   : > { %v706_v8 = vpop.f32.mrb[4].mxu1 }
 0x3cf   : > { %v1106_v9 = vpop.f32.mrb[5].mxu1  ;;  %1112 = vmatprep.subr.mxu0 %v706_v8 }
 0x3d0   : > { %1113 = vmatpush3.msra.mxu0 %v706_v8 }
 0x3d1   : > { %1115 = vmatmul.mubr.msk.f32.vlgmr.msra.gmra.mrb[2].mxu0 %vm556_vm3, %v600_v7 }
 0x450   : > { %v1111_v5 = vpop.f32.mrb[6].mxu1 }
 0x451   : > { %874 = vrot.lane.b32.xlu1 %v1111_v5, %s1386_s29  ;;  %v782_v11 = vpop.f32.mrb[7].mxu1  ;;  %v867_v12 = vmul.f32 %v1111_v5, %v1646_v15 }
 0x452   : > { %v866_v13 = vmul.f32 %v782_v11, %v1636_v10 }
 0x455   : > { %872 = vrot.lane.b32.xlu1 %v782_v11, %s1386_s29 }
 0x459   : > { %882 = vrot.lane.b32.xlu1 %v867_v12, %s1387_s7 }
 0x45d   : > { %880 = vrot.lane.b32.xlu1 %v866_v13, %s1387_s7 }
 0x4a4   : > { %v1116_v14 = vpop.f32.mrb[2].mxu0 }
 0x4a5   : > { %v857_v16 = vpop.f32.mrb[3].mxu0  ;;  %v869_v18 = vmul.f32 %v1116_v14, %v1646_v15 }
 0x4a6   : > { %v868_v17 = vmul.f32 %v857_v16, %v1636_v10 }
 0x4a8   : > { %888 = vrot.lane.b32.xlu1 %v868_v17, %s1388_s13 }
 0x4ac   : > { %890 = vrot.lane.b32.xlu1 %v869_v18, %s1388_s13 }
 0x4c3   : > { %v875_v19 = vpop.permute.xlu1 %874 }
 0x4c4   : > { %v895_v27 = vsel %vm309_vm1, %v1646_v15, %v875_v19 }
 0x4c7   : > { %v873_v20 = vpop.permute.xlu1 %872 }
 0x4c8   : > { %v894_v23 = vsel %vm309_vm1, %v1636_v10, %v873_v20 }
 0x4cb   : > { %v883_v21 = vpop.permute.xlu1 %882 }
 0x4cc   : > { %v898_v10 = vsel %vm896_vm6, %v895_v27, %v883_v21 }
 0x4cf   : > { %v881_v22 = vpop.permute.xlu1 %880 }
 0x4d0   : > { %v897_v24 = vsel %vm896_vm6, %v894_v23, %v881_v22 }
 0x51a   : > { %v889_v25 = vpop.permute.xlu1 %888 }
 0x51b   : > { %v900_v26 = vsel %vm899_vm5, %v897_v24, %v889_v25 }
 0x51c   : > { %902 = vst [vmem:[%s293_s0] sm:$0xff] %v900_v26 }
 0x51e   : > { %v891_v28 = vpop.permute.xlu1 %890 }
 0x51f   : > { %v901_v29 = vsel %vm899_vm5, %v898_v10, %v891_v28 }
 0x520   : > { %903 = vst [vmem:[%s293_s0 + $0x8] sm:$0xff] %v901_v29 }
 0x521   : > { %1315 = shalt.err (!%p1312_p2)
}
 0x522   : > { %s1316_s10 = scalar_lea.hbm %s1681_s11, 256  ;;  %s1320_s16 = scalar_lea.hbm %s1730_s5, 512 }
 0x523   : > { %p1317_p6 = scmp.ne.s32.totalorder %s1681_s11, %s1316_s10  ;;  %p1321_p12 = scmp.lt.u32.totalorder %s1681_s11, %s1730_s5 }
 0x524   : > { %p1322_p11 = scmp.lt.u32.totalorder %s1320_s16, %s1316_s10  ;;  %p1324_p10 = scmp.lt.u32.totalorder %s1316_s10, %s1681_s11 }
 0x525   : > { %p1318_p8 = pnand %p1317_p6, %p1752_p13 }
 0x526   : > { %p1323_p0 = por %p1322_p11, %p1321_p12 }
 0x527   : > { %p1319_p4 = pneg %p1318_p8 }
 0x528   : > { %p1325_p3 = por %p1324_p10, %p1323_p0 }
 0x52a   : > { %p1326_p7 = pnand %p1325_p3, %p1319_p4 }
 0x52c   : > { %1329 = shalt.err (!%p1326_p7)
}
 0x52d   : > { %s1390_s7 = smov 128   ;;  %s1391_s13 = smov 8  }
 0x52e   : > { %1136 = dma.vmem_to_hbm [thread:$0]  (%p1752_p13), %s1674_s23, 256, %s1681_s11, %s905_s22, %s1390_s7, %s1390_s7, %s1391_s13  }
 0x52f PF: > { %s933_s0 = sand.u32 1, %s1364_s18   ;;  %p1753_p9 = scmp.ne.s32.totalorder %s1738_s25, 0 }
 0x530   : > { %p1754_p1 = scmp.ge.s32.totalorder %s1376_s21, 2  ;;  %s934_s27 = scalar_lea.sflag [#allocation4], %s933_s0 }
 0x532   : > { %p1150_p5 = pnand %p1754_p1, %p1753_p9 }
 0x534   : > { %1359 = dma.done.wait (!%p1150_p5), %s934_s27, 256  }
 0x535   : > { %1361 = vsyncadd (!%p1150_p5), %s934_s27, 4294967040  ;;  %s1755_s28 = sld [smem:[#allocation13_spill]]  ;;  %p21_p2 = scmp.ge.s32.totalorder %s1478_s30, 4  }
 0x536   : > { %s1756_s18 = smov %s1368_s19  ;;  %s1757_s19 = smov %s1372_s20 }
 0x537   : > { %s1759_s21 = smov %s1478_s30  ;;  %23 = sbr.rel (!%p21_p2) target bundleno = 10 (0xa), region = 102 }
 0x53b   : > { %s1758_s20 = smov %s1755_s28 }
 0x53e   :  { %939 = vsyncpa [#allocation3], 1 }
 0x53f   :  { %941 = vsyncpa [#allocation3 + $0x1], 1 }
 0x540   :  { %942 = vsyncpa [#allocation6], 1 }
 0x541   :  { %944 = vsyncpa [#allocation6 + $0x1], 1 }
 0x542   :  { %945 = vsyncpa [#allocation4], 1 }
 0x543   :  { %947 = vsyncpa [#allocation4 + $0x1], 1 }

</bundles_post_ra>
